<compile_context>
chip_gen: v7x
topology: tpu7x:2x2x1
jax: 0.10.0
libtpu: 0.0.40
codegen_flags: <defaults>
</compile_context>

<pallas_src>
import functools

import jax
import jax.numpy as jnp
from jax.experimental import pallas as pl
from jax.experimental.pallas import tpu as pltpu


def _ls_ce_kernel(pred_ref, tgt_ref, out_ref, *, smoothing, n_rows, tile_n):
    logits = pred_ref[...].astype(jnp.float32)                        # (tile_n, C)
    C = logits.shape[-1]

    # Numerically-stable log-sum-exp along the class (lane) axis.
    m = jnp.max(logits, axis=-1, keepdims=True)                       # (tile_n, 1)
    shifted = logits - m                                              # (tile_n, C)
    lse = jnp.log(jnp.sum(jnp.exp(shifted), axis=-1, keepdims=True))  # (tile_n, 1)

    # Gather the shifted logit at the target class via a lane-index compare
    # (no dynamic gather on TPU).
    col = jax.lax.broadcasted_iota(jnp.int32, shifted.shape, 1)
    tgt = tgt_ref[...]                                                # (tile_n, 1) int32
    picked = jnp.sum(jnp.where(col == tgt, shifted, 0.0),
                     axis=-1, keepdims=True)                          # (tile_n, 1)
    row_sum = jnp.sum(shifted, axis=-1, keepdims=True)                # (tile_n, 1)

    # log_prob = shifted - lse  =>
    #   nll    = -log_prob[target]  = lse - picked
    #   smooth = -mean(log_prob)    = lse - row_sum / C
    nll_loss = lse - picked
    smooth_loss = lse - row_sum * (1.0 / C)
    loss = (1.0 - smoothing) * nll_loss + smoothing * smooth_loss     # (tile_n, 1)

    # Mask rows that fall past the end of the batch (last, partial tile).
    row = (jax.lax.broadcasted_iota(jnp.int32, (tile_n, 1), 0)
           + pl.program_id(0) * tile_n)
    loss = jnp.where(row < n_rows, loss, 0.0)

    # One scalar partial per tile, written as an unmasked lane-dense (8,128)
    # store (value in [0,0], zeros elsewhere); wrapper sums the partials.
    partial = jnp.sum(loss)
    sub = jax.lax.broadcasted_iota(jnp.int32, (8, 128), 0)
    lane = jax.lax.broadcasted_iota(jnp.int32, (8, 128), 1)
    out_ref[...] = jnp.where((sub == 0) & (lane == 0), partial, 0.0)


def _round_up(x, m):
    return ((x + m - 1) // m) * m


def _pick_tile_n(n_rows, n_cols, sublane):
    # Budget ~24 MiB for pipeline buffers + in-kernel temporaries, under a
    # 32 MiB scoped VMEM limit (safe on v5e/v6e and on v7x's 64 MiB VMEM).
    vmem_budget = 24 * 1024 * 1024
    # double-buffered pred+target inputs  +  ~4 live full-tile f32 temporaries
    bytes_per_row = 2 * 2 * (n_cols * 4 + 4) + 4 * n_cols * 4
    tile = vmem_budget // bytes_per_row
    tile = min(tile, 1024, _round_up(n_rows, sublane))
    tile = max(sublane, (tile // sublane) * sublane)
    return tile


def label_smoothing_cross_entropy(pred, target, smoothing=0.1, tile_n=None):
    """pred: (N, C) float (f32 or bf16), target: (N,) int. Returns scalar f32 loss sum."""
    N, C = pred.shape
    sublane = 16 if pred.dtype == jnp.bfloat16 else 8
    if tile_n is None:
        tile_n = _pick_tile_n(N, C, sublane)
    num_tiles = pl.cdiv(N, tile_n)

    tgt2d = target.astype(jnp.int32).reshape(N, 1)
    kernel = functools.partial(
        _ls_ce_kernel, smoothing=float(smoothing), n_rows=N, tile_n=tile_n)

    partials = pl.pallas_call(
        kernel,
        out_shape=jax.ShapeDtypeStruct((num_tiles * 8, 128), jnp.float32),
        grid_spec=pltpu.PrefetchScalarGridSpec(
            num_scalar_prefetch=0,
            grid=(num_tiles,),
            in_specs=[
                pl.BlockSpec((tile_n, C), lambda i: (i, 0)),
                pl.BlockSpec((tile_n, 1), lambda i: (i, 0)),
            ],
            out_specs=pl.BlockSpec((8, 128), lambda i: (i, 0)),
        ),
        compiler_params=pltpu.CompilerParams(
            dimension_semantics=("parallel",),      # tiles independent -> megacore on v7x
            vmem_limit_bytes=32 * 1024 * 1024,
        ),
    )(pred, tgt2d)
    return jnp.sum(partials)


def _reference(pred, target, smoothing=0.1):
    log_prob = jax.nn.log_softmax(pred.astype(jnp.float32), axis=-1)
    nll = -jnp.take_along_axis(log_prob, target[:, None], axis=-1)[:, 0]
    smooth = -jnp.mean(log_prob, axis=-1)
    return jnp.sum((1.0 - smoothing) * nll + smoothing * smooth)


if __name__ == "__main__":
    key = jax.random.PRNGKey(0)
    k1, k2 = jax.random.split(key)
    N, C = 16, 32
    pred = jax.random.normal(k1, (N, C), dtype=jnp.float32)
    target = jax.random.randint(k2, (N,), 0, C, dtype=jnp.int32)

    loss = label_smoothing_cross_entropy(pred, target, smoothing=0.1)
    loss = jax.block_until_ready(loss)

    ref = _reference(pred, target, smoothing=0.1)
    assert jnp.allclose(loss, ref, rtol=1e-5, atol=1e-5), (loss, ref)
    print("KERNEL_OK")
</pallas_src>

<mosaic_0001>
module attributes {stable_mosaic.version = 11 : i64} {
  func.func @_ls_ce_kernel(%arg0: i32, %arg1: memref<16x32xf32, #tpu.memory_space<vmem>>, %arg2: memref<16x1xi32, #tpu.memory_space<vmem>>, %arg3: memref<8x128xf32, #tpu.memory_space<vmem>>) attributes {dimension_semantics = [#tpu.dimension_semantics<parallel>], iteration_bounds = array<i64: 1>, scalar_prefetch = 0 : i64, scratch_operands = 0 : i64, tpu.core_type = #tpu.core_type<tc>, window_params = [{transform_indices = @transform_0, window_bounds = array<i64: 16, 32>}, {transform_indices = @transform_1, window_bounds = array<i64: 16, 1>}, {transform_indices = @transform_2, window_bounds = array<i64: 8, 128>}]} {
    %c0 = arith.constant 0 : index
    %c0_0 = arith.constant 0 : index
    %0 = vector.load %arg1[%c0, %c0_0] : memref<16x32xf32, #tpu.memory_space<vmem>>, vector<16x32xf32>
    %cst = arith.constant dense<0xFF800000> : vector<16xf32>
    %1 = vector.multi_reduction <maximumf>, %0, %cst [1] : vector<16x32xf32> to vector<16xf32>
    %2 = vector.shape_cast %1 : vector<16xf32> to vector<16x1xf32>
    %3 = vector.broadcast %2 : vector<16x1xf32> to vector<16x32xf32>
    %4 = arith.subf %0, %3 : vector<16x32xf32>
    %5 = math.exp %4 : vector<16x32xf32>
    %cst_1 = arith.constant dense<0.000000e+00> : vector<16xf32>
    %6 = vector.multi_reduction <add>, %5, %cst_1 [1] : vector<16x32xf32> to vector<16xf32>
    %7 = vector.shape_cast %6 : vector<16xf32> to vector<16x1xf32>
    %8 = math.log %7 : vector<16x1xf32>
    %9 = tpu.iota {dimensions = array<i32: 1>} : vector<16x32xi32>
    %c0_2 = arith.constant 0 : index
    %c0_3 = arith.constant 0 : index
    %10 = vector.load %arg2[%c0_2, %c0_3] : memref<16x1xi32, #tpu.memory_space<vmem>>, vector<16x1xi32>
    %11 = vector.broadcast %10 : vector<16x1xi32> to vector<16x32xi32>
    %12 = arith.cmpi eq, %9, %11 : vector<16x32xi32>
    %cst_4 = arith.constant 0.000000e+00 : f32
    %13 = vector.broadcast %cst_4 : f32 to vector<16x32xf32>
    %14 = arith.select %12, %4, %13 : vector<16x32xi1>, vector<16x32xf32>
    %cst_5 = arith.constant dense<0.000000e+00> : vector<16xf32>
    %15 = vector.multi_reduction <add>, %14, %cst_5 [1] : vector<16x32xf32> to vector<16xf32>
    %16 = vector.shape_cast %15 : vector<16xf32> to vector<16x1xf32>
    %cst_6 = arith.constant dense<0.000000e+00> : vector<16xf32>
    %17 = vector.multi_reduction <add>, %4, %cst_6 [1] : vector<16x32xf32> to vector<16xf32>
    %18 = vector.shape_cast %17 : vector<16xf32> to vector<16x1xf32>
    %19 = arith.subf %8, %16 : vector<16x1xf32>
    %cst_7 = arith.constant 3.125000e-02 : f32
    %20 = vector.broadcast %cst_7 : f32 to vector<16x1xf32>
    %21 = arith.mulf %18, %20 : vector<16x1xf32>
    %22 = arith.subf %8, %21 : vector<16x1xf32>
    %cst_8 = arith.constant 0.899999976 : f32
    %23 = vector.broadcast %cst_8 : f32 to vector<16x1xf32>
    %24 = arith.mulf %23, %19 : vector<16x1xf32>
    %cst_9 = arith.constant 1.000000e-01 : f32
    %25 = vector.broadcast %cst_9 : f32 to vector<16x1xf32>
    %26 = arith.mulf %25, %22 : vector<16x1xf32>
    %27 = arith.addf %24, %26 : vector<16x1xf32>
    %28 = tpu.iota {dimensions = array<i32: 0>} : vector<16x1xi32>
    %c16_i32 = arith.constant 16 : i32
    %29 = arith.muli %arg0, %c16_i32 : i32
    %30 = vector.broadcast %29 : i32 to vector<16x1xi32>
    %31 = arith.addi %28, %30 : vector<16x1xi32>
    %c16_i32_10 = arith.constant 16 : i32
    %32 = vector.broadcast %c16_i32_10 : i32 to vector<16x1xi32>
    %33 = arith.cmpi slt, %31, %32 : vector<16x1xi32>
    %cst_11 = arith.constant 0.000000e+00 : f32
    %34 = vector.broadcast %cst_11 : f32 to vector<16x1xf32>
    %35 = arith.select %33, %27, %34 : vector<16x1xi1>, vector<16x1xf32>
    %36 = vector.shape_cast %35 : vector<16x1xf32> to vector<1x16x1xf32>
    %cst_12 = arith.constant dense<0.000000e+00> : vector<1xf32>
    %37 = vector.multi_reduction <add>, %36, %cst_12 [1, 2] : vector<1x16x1xf32> to vector<1xf32>
    %38 = vector.shape_cast %37 : vector<1xf32> to vector<1x1x1xf32>
    %39 = vector.extract %38[0, 0, 0] : f32 from vector<1x1x1xf32>
    %40 = tpu.iota {dimensions = array<i32: 0>} : vector<8x128xi32>
    %41 = tpu.iota {dimensions = array<i32: 1>} : vector<8x128xi32>
    %c0_i32 = arith.constant 0 : i32
    %42 = vector.broadcast %c0_i32 : i32 to vector<8x128xi32>
    %43 = arith.cmpi eq, %40, %42 : vector<8x128xi32>
    %c0_i32_13 = arith.constant 0 : i32
    %44 = vector.broadcast %c0_i32_13 : i32 to vector<8x128xi32>
    %45 = arith.cmpi eq, %41, %44 : vector<8x128xi32>
    %46 = arith.andi %43, %45 : vector<8x128xi1>
    %cst_14 = arith.constant 0.000000e+00 : f32
    %47 = vector.broadcast %39 : f32 to vector<8x128xf32>
    %48 = vector.broadcast %cst_14 : f32 to vector<8x128xf32>
    %49 = arith.select %46, %47, %48 : vector<8x128xi1>, vector<8x128xf32>
    %c0_15 = arith.constant 0 : index
    %c0_16 = arith.constant 0 : index
    %50 = vector.load %arg3[%c0_15, %c0_16] : memref<8x128xf32, #tpu.memory_space<vmem>>, vector<8x128xf32>
    tpu.vector_store %arg3[%c0_15, %c0_16], %49 {strides = array<i32>} : memref<8x128xf32, #tpu.memory_space<vmem>>, vector<8x128xf32>,
    return
  }
  func.func @transform_0(%arg0: i32) -> (i32, i32) {
    %c0_i32 = arith.constant 0 : i32
    %c0_i32_0 = arith.constant 0 : i32
    return %arg0, %c0_i32 : i32, i32
  }
  func.func @transform_1(%arg0: i32) -> (i32, i32) {
    %c0_i32 = arith.constant 0 : i32
    %c0_i32_0 = arith.constant 0 : i32
    return %arg0, %c0_i32 : i32, i32
  }
  func.func @transform_2(%arg0: i32) -> (i32, i32) {
    %c0_i32 = arith.constant 0 : i32
    %c0_i32_0 = arith.constant 0 : i32
    return %arg0, %c0_i32 : i32, i32
  }
}

</mosaic_0001>

<bundles_post_ra>
// kernel: tpu_custom_call.1
= control target key start
LH: loop header
LB: loop body
LE: loop exit
PB: predicated region body
PF: predicated region fallthrough
CT: control target
= control target key end

     0   :  { %vm14_vm0 = vcmask 261120   ;;  %v157_v4 = vmov 0   ;;  %s206_s0 = inlined_call_operand.vmem [shape: f32[16,32], index: 0, kind: input, shape index: {}]   ;;  %s207_s1 = inlined_call_operand.vmem [shape: s32[16,1], index: 1, kind: input, shape index: {}]   ;;  %s208_s2 = inlined_call_operand.hbm [shape: f32[8,128], index: 2, kind: output, shape index: {}]  }
   0x1   :  { %v12_v0 = vld [vmem:[%s206_s0] sm:$0xff]  ;;  %v13_v1 = vld [vmem:[%s206_s0 + $0x8] sm:$0xff]  ;;  %123 = vset.pattern.permute.xlu1 %v157_v4  ;;  %124 = vset.pattern.permute.xlu0 %v157_v4 }
   0x2   :  { %v39_v2 = vld [vmem:[%s207_s1] sm:$0xff]  ;;  %v15_v3 = vsel %vm14_vm0, %v12_v0, -inf }
   0x3   :  { %7 = vsyncpa [#allocation3], 0  ;;  %16 = vmax.xlane.f32.xlu0 %v15_v3  ;;  %42 = vperm.xlu1 %123, %v39_v2   ;;  %v18_v5 = vsel %vm14_vm0, %v13_v1, -inf  ;;  %v40_v6 = vld [vmem:[%s207_s1 + $0x8] sm:$0xff]  ;;  %v37_v13 = vlaneseq  ;;  %vm86_vm3 = vcmask 7168   ;;  %s158_s0 = smov [#allocation2]  }
   0x4   :  { %s111_s1 = sshll.u32 %s158_s0, 4  ;;  %s112_s1 = int_to_ptr.vmem [resolvable:$true] %s111_s1 }
   0x5   :  { %v38_v17 = vand.u32 127, %v37_v13  ;;  %v76_v59 = vshrl.u32 %v37_v13, 7  ;;  %s133_s18 = scalar_lea.vmem %s112_s1, 128  ;;  %p138_p1 = scmp.lt.s32.totalorder %s112_s1, %s112_s1 }
   0x6   :  { %p134_p0 = scmp.ne.s32.totalorder %s112_s1, %s133_s18  ;;  %p139_p2 = scmp.lt.s32.totalorder %s133_s18, %s133_s18 }
   0x7   :  { %19 = vmax.xlane.f32.xlu0 %v18_v5  ;;  %45 = vperm.xlu1 %123, %v40_v6   ;;  %vm99_vm4 = vcmp.eq.s32.totalorder %v76_v59, 0  ;;  %vm100_vm5 = vcmp.eq.s32.totalorder %v38_v17, 0 }
   0x8   :  { %vm101_vm6 = vmand %vm99_vm4, %vm100_vm5  ;;  %p140_p3 = por %p139_p2, %p138_p1 }
   0xa   :  { %p141_p4 = pnand %p140_p3, %p134_p0 }
  0x82   :  { %v43_v16 = vpop.permute.xlu1 %42 }
  0x83   :  { %vm47_vm1 = vcmp.eq.s32.totalorder %v38_v17, %v43_v16 }
  0x86   :  { %v46_v21 = vpop.permute.xlu1 %45 }
  0x87   :  { %vm48_vm2 = vcmp.eq.s32.totalorder %v38_v17, %v46_v21 }
  0x90   :  { %v17_v7 = vpop.xlane.xlu0 %16 }
  0x91   :  { %v21_v8 = vsub.f32 %v12_v0, %v17_v7 }
  0x93   :  { %v23_v9 = vmul.f32 1.442695, %v21_v8  ;;  %v57_v19 = vsel %vm14_vm0, %v21_v8, 0.0  ;;  %v49_v23 = vsel %vm47_vm1, %v21_v8, 0.0 }
  0x94   :  { %v20_v10 = vpop.xlane.xlu0 %19  ;;  %v51_v24 = vsel %vm14_vm0, %v49_v23, 0.0 }
  0x95   :  { %125 = vpow2.f32 %v23_v9  ;;  %v22_v11 = vsub.f32 %v13_v1, %v20_v10 }
  0x97   :  { %v25_v12 = vmul.f32 1.442695, %v22_v11  ;;  %v60_v22 = vsel %vm14_vm0, %v22_v11, 0.0  ;;  %v50_v25 = vsel %vm48_vm2, %v22_v11, 0.0 }
  0x98   :  { %v54_v26 = vsel %vm14_vm0, %v50_v25, 0.0 }
  0x99   :  { %127 = vpow2.f32 %v25_v12 }
  0x9f   :  { %v126_v14 = vpop.eup %125 }
  0xa0   :  { %v27_v15 = vsel %vm14_vm0, %v126_v14, 0.0 }
  0xa1   :  { %28 = vadd.xlane.f32.xlu0 %v27_v15 }
  0xa3   :  { %v128_v18 = vpop.eup %127 }
  0xa4   :  { %v30_v20 = vsel %vm14_vm0, %v128_v18, 0.0 }
  0xa5   :  { %58 = vadd.xlane.f32.xlu0 %v57_v19  ;;  %31 = vadd.xlane.f32.xlu1 %v30_v20 }
  0xa9   :  { %61 = vadd.xlane.f32.xlu0 %v60_v22 }
  0xad   :  { %52 = vadd.xlane.f32.xlu0 %v51_v24 }
  0xb1   :  { %55 = vadd.xlane.f32.xlu0 %v54_v26 }
 0x12e   :  { %v29_v27 = vpop.xlane.xlu0 %28 }
 0x12f   :  { %129 = vlog2.f32 %v29_v27 }
 0x132   :  { %v32_v28 = vpop.xlane.xlu1 %31  ;;  %v59_v29 = vpop.xlane.xlu0 %58 }
 0x133   :  { %131 = vlog2.f32 %v32_v28  ;;  %v65_v33 = vmul.f32 0.03125, %v59_v29 }
 0x136   :  { %v62_v30 = vpop.xlane.xlu0 %61 }
 0x137   :  { %v66_v38 = vmul.f32 0.03125, %v62_v30 }
 0x139   :  { %v130_v31 = vpop.eup %129 }
 0x13a   :  { %v34_v32 = vmul.f32 0.6931472, %v130_v31  ;;  %v53_v34 = vpop.xlane.xlu0 %52 }
 0x13c   :  { %v67_v35 = vsub.f32 %v34_v32, %v65_v33  ;;  %v63_v36 = vsub.f32 %v34_v32, %v53_v34 }
 0x13d   :  { %v132_v37 = vpop.eup %131 }
 0x13e   :  { %v36_v39 = vmul.f32 0.6931472, %v132_v37  ;;  %v71_v40 = vmul.f32 0.1, %v67_v35  ;;  %v69_v41 = vmul.f32 0.9, %v63_v36  ;;  %v56_v42 = vpop.xlane.xlu0 %55 }
 0x140   :  { %v68_v43 = vsub.f32 %v36_v39, %v66_v38  ;;  %v64_v44 = vsub.f32 %v36_v39, %v56_v42  ;;  %v73_v46 = vadd.f32 %v71_v40, %v69_v41 }
 0x142   :  { %v72_v45 = vmul.f32 0.1, %v68_v43  ;;  %v70_v47 = vmul.f32 0.9, %v64_v44  ;;  %v87_v49 = vsel %vm86_vm3, %v73_v46, 0.0 }
 0x144   :  { %v74_v48 = vadd.f32 %v72_v45, %v70_v47 }
 0x146   :  { %v88_v50 = vsel %vm86_vm3, %v74_v48, 0.0 }
 0x147   :  { %v89_v51 = vadd.f32 %v88_v50, %v87_v49 }
 0x149   :  { %90 = vadd.xlane.f32.xlu0 %v89_v51 }
 0x1d6   :  { %v91_v52 = vpop.xlane.xlu0 %90 }
 0x1d7   :  { %v92_v53 = vrot.slane %v91_v52, 4 }
 0x1d9   :  { %v93_v54 = vadd.f32 %v92_v53, %v91_v52 }
 0x1db   :  { %v94_v55 = vrot.slane %v93_v54, 2 }
 0x1dd   :  { %v95_v56 = vadd.f32 %v94_v55, %v93_v54 }
 0x1df   :  { %v96_v57 = vrot.slane %v95_v56, 1 }
 0x1e1   :  { %v97_v58 = vadd.f32 %v96_v57, %v95_v56 }
 0x1e3   :  { %119 = vpush %v97_v58 }
 0x214   :  { %s120_s17 = spop %119 }
 0x215   :  { %v102_v60 = vstv %s120_s17 }
 0x216   :  { %v103_v61 = vsel %vm101_vm6, %v102_v60, 0.0 }
 0x217   :  { %104 = vst [vmem:[#allocation2] sm:$0xff] %v103_v61 }
 0x218   :  { %144 = shalt.err (!%p141_p4)
}
 0x219   :  { %s145_s21 = scalar_lea.hbm %s208_s2, 128 }
 0x21a   :  { %p146_p5 = scmp.ne.s32.totalorder %s208_s2, %s145_s21  ;;  %p149_p6 = scmp.lt.u32.totalorder %s145_s21, %s208_s2 }
 0x21c   :  { %p151_p7 = pnand %p149_p6, %p146_p5 }
 0x21e   :  { %154 = shalt.err (!%p151_p7)
}
 0x21f   :  { %114 = dma.vmem_to_hbm [thread:$0]  %s112_s1, 128, %s208_s2, [#allocation3]  }
 0x220   :  { %155 = dma.done.wait [#allocation3], 128  }
 0x221   :  { %156 = vsyncadd [#allocation3], 4294967168 }
 0x222   :  { %118 = vsyncpa [#allocation3], 1 }

</bundles_post_ra>
